<compile_context>
chip_gen: v7x
topology: tpu7x:2x2x1
jax: 0.10.0
libtpu: 0.0.40
codegen_flags: <defaults>
</compile_context>

<pallas_src>
import jax
import jax.numpy as jnp
from jax.experimental import pallas as pl
from jax.experimental.pallas import tpu as pltpu

_LANES = 128      # vreg lane width (last-dim tiling unit)
_SUBLANES = 8     # vreg sublane count (second-to-last-dim tiling unit)


def _round_up(x, m):
    return ((x + m - 1) // m) * m


def _hsigmoid_kernel(x_ref, o_ref):
    """Elementwise hard-sigmoid: relu6(x + 3) / 6 on one VMEM tile."""
    x = x_ref[...]
    # bf16 / f32 stay in native dtype (native bf16 VPU on v6e/v7x, and on v5e
    # the compiler upcasts internally); everything else computes in f32.
    if x.dtype in (jnp.dtype(jnp.float32), jnp.dtype(jnp.bfloat16)):
        xc = x
    else:
        xc = x.astype(jnp.float32)
    y = jnp.minimum(jnp.maximum(xc + 3.0, 0.0), 6.0) * (1.0 / 6.0)
    o_ref[...] = y.astype(o_ref.dtype)


def hsigmoid_pallas(x, *, block_bytes=4 * 1024 * 1024, inplace=False):
    """Hard-sigmoid over an arbitrarily shaped array via a lane-dense tiled Pallas kernel."""
    orig_shape = x.shape
    n = x.size
    if n == 0:
        return x

    itemsize = jnp.dtype(x.dtype).itemsize

    # ---- lane width: divisibility-aware so the flat reshape stays zero-copy ----
    lane_width = _LANES
    for cand in (2048, 1024, 512, 256):
        if n % cand == 0 and n // cand >= _SUBLANES:
            lane_width = cand
            break

    flat = x.reshape(-1)
    needs_pad = (n % lane_width) != 0
    if needs_pad:
        # Rare path (numel not a multiple of 128): tiny tail pad to one lane row.
        padded_n = _round_up(n, lane_width)
        flat = jnp.pad(flat, (0, padded_n - n))
        rows = padded_n // lane_width
    else:
        rows = n // lane_width

    x2d = flat.reshape(rows, lane_width)

    if rows <= _SUBLANES:
        # Tiny array: single block equal to the full slab (satisfies the
        # "block dims equal full array dims" escape hatch of the (8,128) rule).
        block_rows = rows
        grid = (1,)
    else:
        budget_rows = max(
            _SUBLANES,
            (block_bytes // (lane_width * itemsize)) // _SUBLANES * _SUBLANES,
        )
        # Guarantee >= 2 grid steps whenever the slab spans more than one
        # sublane group, so both v7x TensorCores stream under "parallel".
        block_rows = min(budget_rows, _round_up(pl.cdiv(rows, 2), _SUBLANES))
        grid = (pl.cdiv(rows, block_rows),)
        # Ragged last block: OOB reads feed an elementwise op; OOB writes are
        # masked by Pallas, so no row padding is needed.

    out2d = pl.pallas_call(
        _hsigmoid_kernel,
        out_shape=jax.ShapeDtypeStruct((rows, lane_width), x.dtype),
        grid=grid,
        in_specs=[pl.BlockSpec((block_rows, lane_width), lambda i: (i, 0))],
        out_specs=pl.BlockSpec((block_rows, lane_width), lambda i: (i, 0)),
        compiler_params=pltpu.CompilerParams(
            dimension_semantics=("parallel",),        # shards grid across v7x's 2 TCs
            vmem_limit_bytes=32 * 1024 * 1024,        # 4 MiB blocks x 2 bufs x (in+out) = 16 MiB
        ),
        cost_estimate=pl.CostEstimate(
            flops=3 * n, transcendentals=0, bytes_accessed=2 * n * itemsize),
        # Aliasing only pays off when the caller donates the input at the jit
        # boundary; otherwise XLA inserts a defensive copy, so it is opt-in.
        input_output_aliases=({0: 0} if inplace else {}),
    )(x2d)

    out_flat = out2d.reshape(-1)
    if needs_pad:
        out_flat = out_flat[:n]
    return out_flat.reshape(orig_shape)


class HsigmoidPallas:
    """Port of the PyTorch Hsigmoid module: forward(x) = relu6(x + 3) / 6."""

    def __init__(self, inplace=True):
        # TODO(synk): torch's `inplace=True` has no clean functional-JAX equivalent
        # without caller-side buffer donation; the kernel writes a fresh output.
        self.inplace = inplace

    def __call__(self, x):
        return hsigmoid_pallas(x)

    def __repr__(self):
        return "Hsigmoid()"


# ----------------------------- reference (XLA) for self-check -----------------------------
def _ref_hsigmoid(x):
    return (jnp.clip(x.astype(jnp.float32) + 3.0, 0.0, 6.0) / 6.0).astype(x.dtype)


if __name__ == "__main__":
    key = jax.random.PRNGKey(0)
    B, C, H, W = 2, 4, 16, 16
    # Scale so both clamp branches (x < -3 and x > 3) are exercised.
    x = 4.0 * jax.random.normal(key, (B, C, H, W), jnp.float32)

    mod = HsigmoidPallas()
    y = mod(x)
    jax.block_until_ready(y)
    assert y.shape == x.shape and y.dtype == x.dtype
    assert jnp.allclose(y, _ref_hsigmoid(x), atol=1e-6, rtol=1e-6), "hsigmoid mismatch"

    # Non-tile-aligned numel (exercises the rare tail-pad fallback path).
    x2 = 4.0 * jax.random.normal(jax.random.PRNGKey(1), (3, 5, 17), jnp.float32)
    y2 = mod(x2)
    jax.block_until_ready(y2)
    assert y2.shape == x2.shape
    assert jnp.allclose(y2, _ref_hsigmoid(x2), atol=1e-6, rtol=1e-6), "hsigmoid (padded) mismatch"

    # bf16 path (computed natively in bf16 -> allow a few ULP vs f32 reference).
    x3 = (4.0 * jax.random.normal(jax.random.PRNGKey(2), (2, 4, 8, 32), jnp.float32)).astype(jnp.bfloat16)
    y3 = mod(x3)
    jax.block_until_ready(y3)
    assert y3.shape == x3.shape and y3.dtype == x3.dtype
    assert jnp.allclose(y3.astype(jnp.float32),
                        _ref_hsigmoid(x3).astype(jnp.float32),
                        atol=5e-2), "hsigmoid (bf16) mismatch"

    print("KERNEL_OK")
</pallas_src>

<mosaic_0001>
module attributes {stable_mosaic.version = 11 : i64} {
  func.func @_hsigmoid_kernel(%arg0: i32, %arg1: memref<8x256xf32, #tpu.memory_space<vmem>>, %arg2: memref<8x256xf32, #tpu.memory_space<vmem>>) attributes {dimension_semantics = [#tpu.dimension_semantics<parallel>], iteration_bounds = array<i64: 1>, scalar_prefetch = 0 : i64, scratch_operands = 0 : i64, tpu.core_type = #tpu.core_type<tc>, window_params = [{transform_indices = @transform_0, window_bounds = array<i64: 8, 256>}, {transform_indices = @transform_1, window_bounds = array<i64: 8, 256>}]} {
    %c0 = arith.constant 0 : index
    %c0_0 = arith.constant 0 : index
    %0 = vector.load %arg1[%c0, %c0_0] : memref<8x256xf32, #tpu.memory_space<vmem>>, vector<8x256xf32>
    %cst = arith.constant 3.000000e+00 : f32
    %1 = vector.broadcast %cst : f32 to vector<8x256xf32>
    %2 = arith.addf %0, %1 : vector<8x256xf32>
    %cst_1 = arith.constant 0.000000e+00 : f32
    %3 = vector.broadcast %cst_1 : f32 to vector<8x256xf32>
    %4 = arith.maximumf %2, %3 : vector<8x256xf32>
    %cst_2 = arith.constant 6.000000e+00 : f32
    %5 = vector.broadcast %cst_2 : f32 to vector<8x256xf32>
    %6 = arith.minimumf %4, %5 : vector<8x256xf32>
    %cst_3 = arith.constant 0.166666672 : f32
    %7 = vector.broadcast %cst_3 : f32 to vector<8x256xf32>
    %8 = arith.mulf %6, %7 : vector<8x256xf32>
    %c0_4 = arith.constant 0 : index
    %c0_5 = arith.constant 0 : index
    %9 = vector.load %arg2[%c0_4, %c0_5] : memref<8x256xf32, #tpu.memory_space<vmem>>, vector<8x256xf32>
    tpu.vector_store %arg2[%c0_4, %c0_5], %8 {strides = array<i32>} : memref<8x256xf32, #tpu.memory_space<vmem>>, vector<8x256xf32>,
    return
  }
  func.func @transform_0(%arg0: i32) -> (i32, i32) {
    %c0_i32 = arith.constant 0 : i32
    %c0_i32_0 = arith.constant 0 : i32
    return %arg0, %c0_i32 : i32, i32
  }
  func.func @transform_1(%arg0: i32) -> (i32, i32) {
    %c0_i32 = arith.constant 0 : i32
    %c0_i32_0 = arith.constant 0 : i32
    return %arg0, %c0_i32 : i32, i32
  }
}

</mosaic_0001>

<bundles_post_ra>
// kernel: tpu_custom_call.1
= control target key start
LH: loop header
LB: loop body
LE: loop exit
PB: predicated region body
PF: predicated region fallthrough
CT: control target
= control target key end

     0   :  { %6 = vsyncpa [#allocation3], 0  ;;  %s134_s0 = inlined_call_operand.hbm [shape: f32[8,256], index: 0, kind: input, shape index: {}]   ;;  %s135_s1 = inlined_call_operand.hbm [shape: f32[8,256], index: 1, kind: output, shape index: {}]  }
   0x1   :  { %7 = vsyncpa [#allocation4], 0  ;;  %s98_s6 = smov [#allocation2]   ;;  %s50_s10 = scalar_lea.hbm %s134_s0, 256 }
   0x2   :  { %s14_s7 = sshll.u32 %s98_s6, 4  ;;  %p51_p0 = scmp.ne.s32.totalorder %s134_s0, %s50_s10  ;;  %s15_s7 = int_to_ptr.vmem [resolvable:$true] %s14_s7 }
   0x3   :  { %p54_p1 = scmp.lt.u32.totalorder %s50_s10, %s134_s0 }
   0x5   :  { %p56_p2 = pnand %p54_p1, %p51_p0 }
   0x7   :  { %59 = shalt.err (!%p56_p2)
}
   0x8   :  { %s60_s15 = scalar_lea.vmem %s15_s7, 256  ;;  %p65_p4 = scmp.lt.s32.totalorder %s15_s7, %s15_s7 }
   0x9   :  { %p61_p3 = scmp.ne.s32.totalorder %s15_s7, %s60_s15  ;;  %p66_p5 = scmp.lt.s32.totalorder %s60_s15, %s60_s15 }
   0xb   :  { %p67_p6 = por %p66_p5, %p65_p4 }
   0xd   :  { %p68_p7 = pnand %p67_p6, %p61_p3 }
   0xf   :  { %71 = shalt.err (!%p68_p7)
}
  0x10   :  { %17 = dma.hbm_to_vmem [thread:$0]  %s134_s0, 256, %s15_s7, [#allocation3]  }
  0x11   :  { %94 = dma.done.wait [#allocation3], 256  }
  0x12   :  { %95 = vsyncadd [#allocation3], 4294967040  ;;  %v21_v0 = vld [vmem:[#allocation2] sm:$0xff]  ;;  %v22_v1 = vld [vmem:[#allocation2 + $0x8] sm:$0xff]  ;;  %s99_s18 = smov [#allocation5]  }
  0x13   :  { %v23_v2 = vadd.f32 3.0, %v21_v0  ;;  %v24_v3 = vadd.f32 3.0, %v22_v1  ;;  %s39_s19 = sshll.u32 %s99_s18, 4  ;;  %s40_s19 = int_to_ptr.vmem [resolvable:$true] %s39_s19 }
  0x14   :  { %s72_s20 = scalar_lea.vmem %s40_s19, 256  ;;  %p77_p9 = scmp.lt.s32.totalorder %s40_s19, %s40_s19 }
  0x15   :  { %v25_v4 = vmax.f32 %v23_v2, 0.0  ;;  %v26_v5 = vmax.f32 %v24_v3, 0.0  ;;  %p73_p8 = scmp.ne.s32.totalorder %s40_s19, %s72_s20  ;;  %p78_p10 = scmp.lt.s32.totalorder %s72_s20, %s72_s20 }
  0x17   :  { %v27_v6 = vmin.f32 %v25_v4, 6.0  ;;  %v28_v7 = vmin.f32 %v26_v5, 6.0  ;;  %p79_p11 = por %p78_p10, %p77_p9 }
  0x19   :  { %v29_v8 = vmul.f32 0.16666667, %v27_v6  ;;  %v30_v9 = vmul.f32 0.16666667, %v28_v7  ;;  %p80_p12 = pnand %p79_p11, %p73_p8 }
  0x1b   :  { %31 = vst [vmem:[#allocation5] sm:$0xff] %v29_v8  ;;  %32 = vst [vmem:[#allocation5 + $0x8] sm:$0xff] %v30_v9 }
  0x1c   :  { %83 = shalt.err (!%p80_p12)
}
  0x1d   :  { %s84_s22 = scalar_lea.hbm %s135_s1, 256 }
  0x1e   :  { %p85_p13 = scmp.ne.s32.totalorder %s135_s1, %s84_s22  ;;  %p88_p0 = scmp.lt.u32.totalorder %s84_s22, %s135_s1 }
  0x20   :  { %p90_p1 = pnand %p88_p0, %p85_p13 }
  0x22   :  { %93 = shalt.err (!%p90_p1)
}
  0x23   :  { %42 = dma.vmem_to_hbm [thread:$0]  %s40_s19, 256, %s135_s1, [#allocation4]  }
  0x24   :  { %96 = dma.done.wait [#allocation4], 256  }
  0x25   :  { %97 = vsyncadd [#allocation4], 4294967040 }
  0x26   :  { %46 = vsyncpa [#allocation3], 1 }
  0x27   :  { %47 = vsyncpa [#allocation4], 1 }

</bundles_post_ra>
